<compile_context>
chip_gen: v7x
topology: tpu7x:2x2x1
jax: 0.10.0
libtpu: 0.0.40
codegen_flags: <defaults>
</compile_context>

<pallas_src>
import functools

import jax
import jax.numpy as jnp
from jax.experimental import pallas as pl
from jax.experimental.pallas import tpu as pltpu


_LANES = 128                  # vreg lane width / stats accumulator lane width
_MAX_UNROLL_SLABS = 64        # max statically unrolled 128-lane slabs per block
_FUSED_VMEM_BUDGET = 24 << 20 # single-call fast path budget (safe on v7x)


# --------------------------------------------------------------------------
# Kernels
# --------------------------------------------------------------------------
def _partial_stats_kernel(x_ref, psum_ref, psq_ref):
    """Grid: (split, c_block, n, hw_block); (n, hw_block) are reduction axes.

    Accumulates per-channel sum / sum-of-squares (fp32) directly into the
    resident output blocks (one partial result per `split` for megacore)."""
    n = pl.program_id(2)
    t = pl.program_id(3)

    @pl.when(jnp.logical_and(n == 0, t == 0))
    def _init():
        psum_ref[...] = jnp.zeros_like(psum_ref)
        psq_ref[...] = jnp.zeros_like(psq_ref)

    x = x_ref[0]                                  # (c_tile, hw_tile)
    hw_tile = x.shape[-1]
    acc_lanes = psum_ref.shape[-1]
    if acc_lanes > 1:
        # Lane-parallel VPU accumulation over 128-lane slabs; the cross-lane
        # reduction happens once in the finalize kernel (keeps the XLU idle).
        for i in range(hw_tile // acc_lanes):
            xs = x[:, i * acc_lanes:(i + 1) * acc_lanes].astype(jnp.float32)
            psum_ref[0] += xs
            psq_ref[0] += xs * xs
    else:
        # Non-128-aligned (or very wide) lane tile: in-block XLU reduce.
        xf = x.astype(jnp.float32)
        psum_ref[0] += jnp.sum(xf, axis=-1, keepdims=True)
        psq_ref[0] += jnp.sum(xf * xf, axis=-1, keepdims=True)


def _finalize_kernel(psum_ref, psq_ref, gamma_ref, beta_ref, rmean_ref,
                     rvar_ref, scale_ref, bias_ref, new_rmean_ref,
                     new_rvar_ref, *, eps, momentum, inv_count):
    """Tiny single-program kernel: combine split partials, fold the affine
    into scale/bias and update running stats (biased variance, per spec)."""
    acc_s = psum_ref[0]                           # (C, acc_lanes)
    acc_q = psq_ref[0]
    for s in range(1, psum_ref.shape[0]):
        acc_s = acc_s + psum_ref[s]
        acc_q = acc_q + psq_ref[s]
    total = jnp.sum(acc_s, axis=-1, keepdims=True)      # (C, 1)
    total_sq = jnp.sum(acc_q, axis=-1, keepdims=True)   # (C, 1)
    mean = total * inv_count
    # NOTE: E[x^2]-E[x]^2 in fp32; for |mean| >> std over huge N*H*W consider
    # a shifted / Welford-style accumulation.
    var = jnp.maximum(total_sq * inv_count - mean * mean, 0.0)  # biased
    gamma = gamma_ref[...].astype(jnp.float32)
    beta = beta_ref[...].astype(jnp.float32)
    scale = gamma * jax.lax.rsqrt(var + eps)
    scale_ref[...] = scale
    bias_ref[...] = beta - mean * scale
    new_rmean_ref[...] = (
        momentum * mean
        + (1.0 - momentum) * rmean_ref[...].astype(jnp.float32)
    ).astype(new_rmean_ref.dtype)
    new_rvar_ref[...] = (
        momentum * var
        + (1.0 - momentum) * rvar_ref[...].astype(jnp.float32)
    ).astype(new_rvar_ref.dtype)


def _normalize_kernel(x_ref, scale_ref, bias_ref, y_ref):
    """y = x * scale + bias, computed in the input dtype (bf16-native FMA on
    v6e/v7x; fp32 inputs are unaffected; v5e promotes internally)."""
    x = x_ref[0]                                  # (c_tile, hw_tile)
    scale = scale_ref[...].astype(x.dtype)        # (c_tile, 1)
    bias = bias_ref[...].astype(x.dtype)          # (c_tile, 1)
    y_ref[0] = (x * scale + bias).astype(y_ref.dtype)


def _fused_bn_kernel(x_ref, gamma_ref, beta_ref, rmean_ref, rvar_ref,
                     y_ref, new_rmean_ref, new_rvar_ref,
                     *, eps, momentum, inv_count):
    """Single-call fast path: whole (N, C, HW) resident in VMEM."""
    nb = x_ref.shape[0]
    x0 = x_ref[0].astype(jnp.float32)             # (C, HW)
    acc_s = jnp.sum(x0, axis=-1, keepdims=True)   # (C, 1)
    acc_q = jnp.sum(x0 * x0, axis=-1, keepdims=True)
    for i in range(1, nb):
        xi = x_ref[i].astype(jnp.float32)
        acc_s = acc_s + jnp.sum(xi, axis=-1, keepdims=True)
        acc_q = acc_q + jnp.sum(xi * xi, axis=-1, keepdims=True)
    mean = acc_s * inv_count
    var = jnp.maximum(acc_q * inv_count - mean * mean, 0.0)     # biased
    gamma = gamma_ref[...].astype(jnp.float32)
    beta = beta_ref[...].astype(jnp.float32)
    scale = gamma * jax.lax.rsqrt(var + eps)
    bias = beta - mean * scale
    new_rmean_ref[...] = (
        momentum * mean
        + (1.0 - momentum) * rmean_ref[...].astype(jnp.float32)
    ).astype(new_rmean_ref.dtype)
    new_rvar_ref[...] = (
        momentum * var
        + (1.0 - momentum) * rvar_ref[...].astype(jnp.float32)
    ).astype(new_rvar_ref.dtype)
    for i in range(nb):
        y_ref[i] = (x_ref[i].astype(jnp.float32) * scale
                    + bias).astype(y_ref.dtype)


# --------------------------------------------------------------------------
# Tiling / VMEM planning
# --------------------------------------------------------------------------
def _pick_tiles(C, HW, itemsize, target_block_bytes=4 * 1024 * 1024):
    """Channel (sublane) and spatial (lane) tile sizes, dtype-aware."""
    # Channel tile: full C unless C is a large multiple of 8.
    if C % 8 != 0 or C <= 512:
        c_tile = C
    else:
        c_tile = 512
        while C % c_tile != 0:
            c_tile -= 8
    # Spatial tile: ~target bytes per block (actual itemsize, not fp32).
    max_hw = max(1, target_block_bytes // max(1, c_tile * itemsize))
    if HW % 128 == 0:
        max_hw = max(128, (max_hw // 128) * 128)
        hw_tile = min(HW, max_hw)
        while HW % hw_tile != 0:
            hw_tile -= 128
    else:
        # Budget-bounded divisor of HW: never a single giant block.
        if HW <= max_hw:
            hw_tile = HW
        else:
            hw_tile = 1
            d = 1
            while d * d <= HW:
                if HW % d == 0:
                    if d <= max_hw:
                        hw_tile = max(hw_tile, d)
                    q = HW // d
                    if q <= max_hw:
                        hw_tile = max(hw_tile, q)
                d += 1
    return c_tile, hw_tile


def _vmem_limit_bytes(plan_bytes):
    # Explicit scoped-VMEM request: at least 32 MiB (above the 16/32 MiB
    # defaults so larger tiles are honoured), capped at 48 MiB to leave
    # headroom below v7x's 64 MiB physical VMEM.
    return int(min(max(plan_bytes * 5 // 4 + (2 << 20), 32 << 20), 48 << 20))


# --------------------------------------------------------------------------
# Wrappers
# --------------------------------------------------------------------------
def _batchnorm_fused(x3d, g2d, b2d, rm2d, rv2d, eps, momentum, donate_x):
    N, C, HW = x3d.shape
    itemsize = jnp.dtype(x3d.dtype).itemsize
    plan = N * C * HW * 2 * itemsize + C * HW * 8
    fused = functools.partial(
        _fused_bn_kernel, eps=float(eps), momentum=float(momentum),
        inv_count=1.0 / float(N * HW))
    full = pl.BlockSpec((N, C, HW), lambda i: (0, 0, 0))
    cvec = pl.BlockSpec((C, 1), lambda i: (0, 0))
    return pl.pallas_call(
        fused,
        out_shape=(
            jax.ShapeDtypeStruct((N, C, HW), x3d.dtype),
            jax.ShapeDtypeStruct((C, 1), rm2d.dtype),
            jax.ShapeDtypeStruct((C, 1), rv2d.dtype),
        ),
        grid_spec=pltpu.PrefetchScalarGridSpec(
            num_scalar_prefetch=0, grid=(1,),
            in_specs=[full, cvec, cvec, cvec, cvec],
            out_specs=(full, cvec, cvec),
        ),
        compiler_params=pltpu.CompilerParams(
            dimension_semantics=("arbitrary",),
            vmem_limit_bytes=_vmem_limit_bytes(plan)),
        input_output_aliases=({0: 0} if donate_x else {}),
    )(x3d, g2d, b2d, rm2d, rv2d)


def _batchnorm_two_pass(x3d, g2d, b2d, rm2d, rv2d, eps, momentum, donate_x):
    N, C, HW = x3d.shape
    itemsize = jnp.dtype(x3d.dtype).itemsize
    c_tile, hw_tile = _pick_tiles(C, HW, itemsize)
    c_blocks = C // c_tile
    hw_blocks = HW // hw_tile

    # Split the stats reduction 2-way so both v7x TensorCores stream HBM.
    if N % 2 == 0 and N >= 2:
        n_split = 2
        n_per = N // 2
        x_stats_map = lambda s, c, n, t, _np=n_per: (s * _np + n, c, t)
        n_steps, hw_steps = n_per, hw_blocks
    elif hw_blocks % 2 == 0 and hw_blocks >= 2:
        n_split = 2
        hw_per = hw_blocks // 2
        x_stats_map = lambda s, c, n, t, _hp=hw_per: (n, c, s * _hp + t)
        n_steps, hw_steps = N, hw_per
    else:
        n_split = 1
        x_stats_map = lambda s, c, n, t: (n, c, t)
        n_steps, hw_steps = N, hw_blocks

    num_slabs = hw_tile // _LANES
    acc_lanes = _LANES if (hw_tile % _LANES == 0
                           and 1 <= num_slabs <= _MAX_UNROLL_SLABS) else 1

    x_block_bytes = c_tile * hw_tile * itemsize
    pass1_plan = 2 * x_block_bytes + 2 * c_tile * hw_tile * 4 \
        + 8 * c_tile * acc_lanes * 4
    pass2_plan = 4 * x_block_bytes + c_tile * hw_tile * 4

    # ---------------- pass 1: per-channel partial sums ---------------------
    pacc_spec = pl.BlockSpec((1, c_tile, acc_lanes),
                             lambda s, c, n, t: (s, c, 0))
    psum, psq = pl.pallas_call(
        _partial_stats_kernel,
        out_shape=(
            jax.ShapeDtypeStruct((n_split, C, acc_lanes), jnp.float32),
            jax.ShapeDtypeStruct((n_split, C, acc_lanes), jnp.float32),
        ),
        grid_spec=pltpu.PrefetchScalarGridSpec(
            num_scalar_prefetch=0,
            grid=(n_split, c_blocks, n_steps, hw_steps),
            in_specs=[pl.BlockSpec((1, c_tile, hw_tile), x_stats_map)],
            out_specs=(pacc_spec, pacc_spec),
        ),
        compiler_params=pltpu.CompilerParams(
            dimension_semantics=("parallel", "parallel",
                                 "arbitrary", "arbitrary"),
            vmem_limit_bytes=_vmem_limit_bytes(pass1_plan)),
    )(x3d)

    # ---------------- finalize: scale/bias + running stats -----------------
    finalize = functools.partial(
        _finalize_kernel, eps=float(eps), momentum=float(momentum),
        inv_count=1.0 / float(N * HW))
    cvec = pl.BlockSpec((C, 1), lambda i: (0, 0))
    pvec = pl.BlockSpec((n_split, C, acc_lanes), lambda i: (0, 0, 0))
    scale, bias, new_rm2d, new_rv2d = pl.pallas_call(
        finalize,
        out_shape=(
            jax.ShapeDtypeStruct((C, 1), jnp.float32),
            jax.ShapeDtypeStruct((C, 1), jnp.float32),
            jax.ShapeDtypeStruct((C, 1), rm2d.dtype),
            jax.ShapeDtypeStruct((C, 1), rv2d.dtype),
        ),
        grid_spec=pltpu.PrefetchScalarGridSpec(
            num_scalar_prefetch=0, grid=(1,),
            in_specs=[pvec, pvec, cvec, cvec, cvec, cvec],
            out_specs=(cvec, cvec, cvec, cvec),
        ),
        compiler_params=pltpu.CompilerParams(
            dimension_semantics=("arbitrary",)),
    )(psum, psq, g2d, b2d, rm2d, rv2d)

    # ---------------- pass 2: y = x * scale + bias --------------------------
    cvec2 = pl.BlockSpec((c_tile, 1), lambda n, c, t: (c, 0))
    y3d = pl.pallas_call(
        _normalize_kernel,
        out_shape=jax.ShapeDtypeStruct((N, C, HW), x3d.dtype),
        grid_spec=pltpu.PrefetchScalarGridSpec(
            num_scalar_prefetch=0,
            grid=(N, c_blocks, hw_blocks),
            in_specs=[
                pl.BlockSpec((1, c_tile, hw_tile), lambda n, c, t: (n, c, t)),
                cvec2, cvec2,
            ],
            out_specs=pl.BlockSpec((1, c_tile, hw_tile),
                                   lambda n, c, t: (n, c, t)),
        ),
        compiler_params=pltpu.CompilerParams(
            dimension_semantics=("parallel", "parallel", "parallel"),
            vmem_limit_bytes=_vmem_limit_bytes(pass2_plan)),
        input_output_aliases=({0: 0} if donate_x else {}),
    )(x3d, scale, bias)
    return y3d, new_rm2d, new_rv2d


def batchnorm_forward(x_nchw, gamma, beta, running_mean, running_var,
                      eps=1e-5, momentum=0.1, *, allow_fused=True,
                      donate_x=False):
    """Training-mode BatchNorm forward (matches the PyTorch module spec).

    Args:
      x_nchw:       (N, C, H, W)
      gamma, beta:  (1, C, 1, 1)
      running_mean, running_var: (1, C, 1, 1)
      allow_fused:  enable the single-call fast path for small activations.
      donate_x:     write y into x's HBM buffer (only if x is dead afterwards).
    Returns:
      y (N, C, H, W), new_running_mean (1,C,1,1), new_running_var (1,C,1,1)
    """
    N, C, H, W = x_nchw.shape
    HW = H * W

    # Free reshapes only -- no HBM transpose passes.
    x3d = x_nchw.reshape(N, C, HW)
    g2d = gamma.reshape(C, 1)
    b2d = beta.reshape(C, 1)
    rm2d = running_mean.reshape(C, 1)
    rv2d = running_var.reshape(C, 1)

    itemsize = jnp.dtype(x_nchw.dtype).itemsize
    fused_plan = N * C * HW * 2 * itemsize + C * HW * 8
    if allow_fused and fused_plan <= _FUSED_VMEM_BUDGET:
        y3d, new_rm2d, new_rv2d = _batchnorm_fused(
            x3d, g2d, b2d, rm2d, rv2d, eps, momentum, donate_x)
    else:
        y3d, new_rm2d, new_rv2d = _batchnorm_two_pass(
            x3d, g2d, b2d, rm2d, rv2d, eps, momentum, donate_x)

    y = y3d.reshape(N, C, H, W)
    new_rm = new_rm2d.reshape(1, C, 1, 1)
    new_rv = new_rv2d.reshape(1, C, 1, 1)
    return y, new_rm, new_rv


if __name__ == "__main__":
    key = jax.random.PRNGKey(0)
    N, C, H, W = 2, 4, 16, 16
    x = jax.random.normal(key, (N, C, H, W), dtype=jnp.float32)

    # Deterministic parameter / buffer init (matches nn.Module __init__).
    gamma = jnp.ones((1, C, 1, 1), dtype=jnp.float32)
    beta = jnp.zeros((1, C, 1, 1), dtype=jnp.float32)
    running_mean = jnp.zeros((1, C, 1, 1), dtype=jnp.float32)
    running_var = jnp.ones((1, C, 1, 1), dtype=jnp.float32)

    # Pure-JAX reference (biased variance, per the module spec).
    bm = jnp.mean(x, axis=(0, 2, 3), keepdims=True)
    bv = jnp.var(x, axis=(0, 2, 3), keepdims=True)
    y_ref = (x - bm) / jnp.sqrt(bv + 1e-5) * gamma + beta
    rm_ref = 0.1 * bm + 0.9 * running_mean
    rv_ref = 0.1 * bv + 0.9 * running_var

    # Exercise both paths: fused single-call (small activations) and the
    # tiled two-pass pipeline (large activations).
    fwd_fused = jax.jit(functools.partial(batchnorm_forward, allow_fused=True))
    fwd_tiled = jax.jit(functools.partial(batchnorm_forward, allow_fused=False))
    y1, rm1, rv1 = fwd_fused(x, gamma, beta, running_mean, running_var)
    y2, rm2, rv2 = fwd_tiled(x, gamma, beta, running_mean, running_var)
    jax.block_until_ready((y1, rm1, rv1, y2, rm2, rv2))

    for yk, rmk, rvk in ((y1, rm1, rv1), (y2, rm2, rv2)):
        assert jnp.allclose(yk, y_ref, atol=1e-5, rtol=1e-5)
        assert jnp.allclose(rmk, rm_ref, atol=1e-6, rtol=1e-6)
        assert jnp.allclose(rvk, rv_ref, atol=1e-5, rtol=1e-5)
    print("KERNEL_OK")
</pallas_src>

<mosaic_0001>
module attributes {stable_mosaic.version = 11 : i64} {
  func.func @_fused_bn_kernel(%arg0: i32, %arg1: memref<2x4x256xf32, #tpu.memory_space<vmem>>, %arg2: memref<4x1xf32, #tpu.memory_space<vmem>>, %arg3: memref<4x1xf32, #tpu.memory_space<vmem>>, %arg4: memref<4x1xf32, #tpu.memory_space<vmem>>, %arg5: memref<4x1xf32, #tpu.memory_space<vmem>>, %arg6: memref<2x4x256xf32, #tpu.memory_space<vmem>>, %arg7: memref<4x1xf32, #tpu.memory_space<vmem>>, %arg8: memref<4x1xf32, #tpu.memory_space<vmem>>) attributes {dimension_semantics = [#tpu.dimension_semantics<arbitrary>], iteration_bounds = array<i64: 1>, scalar_prefetch = 0 : i64, scratch_operands = 0 : i64, tpu.core_type = #tpu.core_type<tc>, window_params = [{pipeline_mode = #tpu.pipeline_mode<synchronous>, transform_indices = @transform_0, window_bounds = array<i64: 2, 4, 256>}, {pipeline_mode = #tpu.pipeline_mode<synchronous>, transform_indices = @transform_1, window_bounds = array<i64: 4, 1>}, {pipeline_mode = #tpu.pipeline_mode<synchronous>, transform_indices = @transform_2, window_bounds = array<i64: 4, 1>}, {pipeline_mode = #tpu.pipeline_mode<synchronous>, transform_indices = @transform_3, window_bounds = array<i64: 4, 1>}, {pipeline_mode = #tpu.pipeline_mode<synchronous>, transform_indices = @transform_4, window_bounds = array<i64: 4, 1>}, {pipeline_mode = #tpu.pipeline_mode<synchronous>, transform_indices = @transform_5, window_bounds = array<i64: 2, 4, 256>}, {pipeline_mode = #tpu.pipeline_mode<synchronous>, transform_indices = @transform_6, window_bounds = array<i64: 4, 1>}, {pipeline_mode = #tpu.pipeline_mode<synchronous>, transform_indices = @transform_7, window_bounds = array<i64: 4, 1>}]} {
    %c0 = arith.constant 0 : index
    %c0_0 = arith.constant 0 : index
    %c0_1 = arith.constant 0 : index
    %0 = vector.load %arg1[%c0, %c0_0, %c0_1] : memref<2x4x256xf32, #tpu.memory_space<vmem>>, vector<1x4x256xf32>
    %1 = vector.shape_cast %0 : vector<1x4x256xf32> to vector<4x256xf32>
    %cst = arith.constant dense<0.000000e+00> : vector<4xf32>
    %2 = vector.multi_reduction <add>, %1, %cst [1] : vector<4x256xf32> to vector<4xf32>
    %3 = vector.shape_cast %2 : vector<4xf32> to vector<4x1xf32>
    %4 = arith.mulf %1, %1 : vector<4x256xf32>
    %cst_2 = arith.constant dense<0.000000e+00> : vector<4xf32>
    %5 = vector.multi_reduction <add>, %4, %cst_2 [1] : vector<4x256xf32> to vector<4xf32>
    %6 = vector.shape_cast %5 : vector<4xf32> to vector<4x1xf32>
    %c1 = arith.constant 1 : index
    %c0_3 = arith.constant 0 : index
    %c0_4 = arith.constant 0 : index
    %7 = vector.load %arg1[%c1, %c0_3, %c0_4] : memref<2x4x256xf32, #tpu.memory_space<vmem>>, vector<1x4x256xf32>
    %8 = vector.shape_cast %7 : vector<1x4x256xf32> to vector<4x256xf32>
    %cst_5 = arith.constant dense<0.000000e+00> : vector<4xf32>
    %9 = vector.multi_reduction <add>, %8, %cst_5 [1] : vector<4x256xf32> to vector<4xf32>
    %10 = vector.shape_cast %9 : vector<4xf32> to vector<4x1xf32>
    %11 = arith.addf %3, %10 : vector<4x1xf32>
    %12 = arith.mulf %8, %8 : vector<4x256xf32>
    %cst_6 = arith.constant dense<0.000000e+00> : vector<4xf32>
    %13 = vector.multi_reduction <add>, %12, %cst_6 [1] : vector<4x256xf32> to vector<4xf32>
    %14 = vector.shape_cast %13 : vector<4xf32> to vector<4x1xf32>
    %15 = arith.addf %6, %14 : vector<4x1xf32>
    %cst_7 = arith.constant 0.001953125 : f32
    %16 = vector.broadcast %cst_7 : f32 to vector<4x1xf32>
    %17 = arith.mulf %11, %16 : vector<4x1xf32>
    %cst_8 = arith.constant 0.001953125 : f32
    %18 = vector.broadcast %cst_8 : f32 to vector<4x1xf32>
    %19 = arith.mulf %15, %18 : vector<4x1xf32>
    %20 = arith.mulf %17, %17 : vector<4x1xf32>
    %21 = arith.subf %19, %20 : vector<4x1xf32>
    %cst_9 = arith.constant 0.000000e+00 : f32
    %22 = vector.broadcast %cst_9 : f32 to vector<4x1xf32>
    %23 = arith.maximumf %21, %22 : vector<4x1xf32>
    %c0_10 = arith.constant 0 : index
    %c0_11 = arith.constant 0 : index
    %24 = vector.load %arg2[%c0_10, %c0_11] : memref<4x1xf32, #tpu.memory_space<vmem>>, vector<4x1xf32>
    %c0_12 = arith.constant 0 : index
    %c0_13 = arith.constant 0 : index
    %25 = vector.load %arg3[%c0_12, %c0_13] : memref<4x1xf32, #tpu.memory_space<vmem>>, vector<4x1xf32>
    %cst_14 = arith.constant 9.99999974E-6 : f32
    %26 = vector.broadcast %cst_14 : f32 to vector<4x1xf32>
    %27 = arith.addf %23, %26 : vector<4x1xf32>
    %28 = math.rsqrt %27 : vector<4x1xf32>
    %29 = arith.mulf %24, %28 : vector<4x1xf32>
    %30 = arith.mulf %17, %29 : vector<4x1xf32>
    %31 = arith.subf %25, %30 : vector<4x1xf32>
    %cst_15 = arith.constant 1.000000e-01 : f32
    %32 = vector.broadcast %cst_15 : f32 to vector<4x1xf32>
    %33 = arith.mulf %32, %17 : vector<4x1xf32>
    %c0_16 = arith.constant 0 : index
    %c0_17 = arith.constant 0 : index
    %34 = vector.load %arg4[%c0_16, %c0_17] : memref<4x1xf32, #tpu.memory_space<vmem>>, vector<4x1xf32>
    %cst_18 = arith.constant 0.899999976 : f32
    %35 = vector.broadcast %cst_18 : f32 to vector<4x1xf32>
    %36 = arith.mulf %35, %34 : vector<4x1xf32>
    %37 = arith.addf %33, %36 : vector<4x1xf32>
    %c0_19 = arith.constant 0 : index
    %c0_20 = arith.constant 0 : index
    %38 = vector.load %arg7[%c0_19, %c0_20] : memref<4x1xf32, #tpu.memory_space<vmem>>, vector<4x1xf32>
    tpu.vector_store %arg7[%c0_19, %c0_20], %37 {strides = array<i32>} : memref<4x1xf32, #tpu.memory_space<vmem>>, vector<4x1xf32>,
    %cst_21 = arith.constant 1.000000e-01 : f32
    %39 = vector.broadcast %cst_21 : f32 to vector<4x1xf32>
    %40 = arith.mulf %39, %23 : vector<4x1xf32>
    %c0_22 = arith.constant 0 : index
    %c0_23 = arith.constant 0 : index
    %41 = vector.load %arg5[%c0_22, %c0_23] : memref<4x1xf32, #tpu.memory_space<vmem>>, vector<4x1xf32>
    %cst_24 = arith.constant 0.899999976 : f32
    %42 = vector.broadcast %cst_24 : f32 to vector<4x1xf32>
    %43 = arith.mulf %42, %41 : vector<4x1xf32>
    %44 = arith.addf %40, %43 : vector<4x1xf32>
    %c0_25 = arith.constant 0 : index
    %c0_26 = arith.constant 0 : index
    %45 = vector.load %arg8[%c0_25, %c0_26] : memref<4x1xf32, #tpu.memory_space<vmem>>, vector<4x1xf32>
    tpu.vector_store %arg8[%c0_25, %c0_26], %44 {strides = array<i32>} : memref<4x1xf32, #tpu.memory_space<vmem>>, vector<4x1xf32>,
    %c0_27 = arith.constant 0 : index
    %c0_28 = arith.constant 0 : index
    %c0_29 = arith.constant 0 : index
    %46 = vector.load %arg1[%c0_27, %c0_28, %c0_29] : memref<2x4x256xf32, #tpu.memory_space<vmem>>, vector<1x4x256xf32>
    %47 = vector.shape_cast %46 : vector<1x4x256xf32> to vector<4x256xf32>
    %48 = vector.broadcast %29 : vector<4x1xf32> to vector<4x256xf32>
    %49 = arith.mulf %47, %48 : vector<4x256xf32>
    %50 = vector.broadcast %31 : vector<4x1xf32> to vector<4x256xf32>
    %51 = arith.addf %49, %50 : vector<4x256xf32>
    %c0_30 = arith.constant 0 : index
    %c0_31 = arith.constant 0 : index
    %c0_32 = arith.constant 0 : index
    %52 = vector.load %arg6[%c0_30, %c0_31, %c0_32] : memref<2x4x256xf32, #tpu.memory_space<vmem>>, vector<1x4x256xf32>
    %53 = vector.shape_cast %52 : vector<1x4x256xf32> to vector<4x256xf32>
    %54 = vector.shape_cast %51 : vector<4x256xf32> to vector<1x4x256xf32>
    tpu.vector_store %arg6[%c0_30, %c0_31, %c0_32], %54 {strides = array<i32>} : memref<2x4x256xf32, #tpu.memory_space<vmem>>, vector<1x4x256xf32>,
    %c1_33 = arith.constant 1 : index
    %c0_34 = arith.constant 0 : index
    %c0_35 = arith.constant 0 : index
    %55 = vector.load %arg1[%c1_33, %c0_34, %c0_35] : memref<2x4x256xf32, #tpu.memory_space<vmem>>, vector<1x4x256xf32>
    %56 = vector.shape_cast %55 : vector<1x4x256xf32> to vector<4x256xf32>
    %57 = vector.broadcast %29 : vector<4x1xf32> to vector<4x256xf32>
    %58 = arith.mulf %56, %57 : vector<4x256xf32>
    %59 = vector.broadcast %31 : vector<4x1xf32> to vector<4x256xf32>
    %60 = arith.addf %58, %59 : vector<4x256xf32>
    %c1_36 = arith.constant 1 : index
    %c0_37 = arith.constant 0 : index
    %c0_38 = arith.constant 0 : index
    %61 = vector.load %arg6[%c1_36, %c0_37, %c0_38] : memref<2x4x256xf32, #tpu.memory_space<vmem>>, vector<1x4x256xf32>
    %62 = vector.shape_cast %61 : vector<1x4x256xf32> to vector<4x256xf32>
    %63 = vector.shape_cast %60 : vector<4x256xf32> to vector<1x4x256xf32>
    tpu.vector_store %arg6[%c1_36, %c0_37, %c0_38], %63 {strides = array<i32>} : memref<2x4x256xf32, #tpu.memory_space<vmem>>, vector<1x4x256xf32>,
    return
  }
  func.func @transform_0(%arg0: i32) -> (i32, i32, i32) {
    %c0_i32 = arith.constant 0 : i32
    %c0_i32_0 = arith.constant 0 : i32
    %c0_i32_1 = arith.constant 0 : i32
    %c0_i32_2 = arith.constant 0 : i32
    return %c0_i32, %c0_i32_0, %c0_i32_1 : i32, i32, i32
  }
  func.func @transform_1(%arg0: i32) -> (i32, i32) {
    %c0_i32 = arith.constant 0 : i32
    %c0_i32_0 = arith.constant 0 : i32
    %c0_i32_1 = arith.constant 0 : i32
    return %c0_i32, %c0_i32_0 : i32, i32
  }
  func.func @transform_2(%arg0: i32) -> (i32, i32) {
    %c0_i32 = arith.constant 0 : i32
    %c0_i32_0 = arith.constant 0 : i32
    %c0_i32_1 = arith.constant 0 : i32
    return %c0_i32, %c0_i32_0 : i32, i32
  }
  func.func @transform_3(%arg0: i32) -> (i32, i32) {
    %c0_i32 = arith.constant 0 : i32
    %c0_i32_0 = arith.constant 0 : i32
    %c0_i32_1 = arith.constant 0 : i32
    return %c0_i32, %c0_i32_0 : i32, i32
  }
  func.func @transform_4(%arg0: i32) -> (i32, i32) {
    %c0_i32 = arith.constant 0 : i32
    %c0_i32_0 = arith.constant 0 : i32
    %c0_i32_1 = arith.constant 0 : i32
    return %c0_i32, %c0_i32_0 : i32, i32
  }
  func.func @transform_5(%arg0: i32) -> (i32, i32, i32) {
    %c0_i32 = arith.constant 0 : i32
    %c0_i32_0 = arith.constant 0 : i32
    %c0_i32_1 = arith.constant 0 : i32
    %c0_i32_2 = arith.constant 0 : i32
    return %c0_i32, %c0_i32_0, %c0_i32_1 : i32, i32, i32
  }
  func.func @transform_6(%arg0: i32) -> (i32, i32) {
    %c0_i32 = arith.constant 0 : i32
    %c0_i32_0 = arith.constant 0 : i32
    %c0_i32_1 = arith.constant 0 : i32
    return %c0_i32, %c0_i32_0 : i32, i32
  }
  func.func @transform_7(%arg0: i32) -> (i32, i32) {
    %c0_i32 = arith.constant 0 : i32
    %c0_i32_0 = arith.constant 0 : i32
    %c0_i32_1 = arith.constant 0 : i32
    return %c0_i32, %c0_i32_0 : i32, i32
  }
}

</mosaic_0001>

<bundles_post_ra>
// kernel: batchnorm_forward.1
= control target key start
LH: loop header
LB: loop body
LE: loop exit
PB: predicated region body
PF: predicated region fallthrough
CT: control target
= control target key end

     0   :  { %vm27_vm0 = vcmask 1043456   ;;  %v142_v20 = vmov 0   ;;  %vm79_vm1 = vcmask 3072   ;;  %v143_v47 = vmov 839922192   ;;  %s238_s0 = inlined_call_operand.vmem [shape: f32[2,4,256], index: 0, kind: input, shape index: {}]   ;;  %s239_s3 = inlined_call_operand.vmem [shape: f32[4,1], index: 3, kind: input, shape index: {}]   ;;  %s240_s4 = inlined_call_operand.vmem [shape: f32[4,1], index: 4, kind: input, shape index: {}]   ;;  %s241_s6 = inlined_call_operand.vmem [shape: f32[4,1], index: 6, kind: output, shape index: {1}]   ;;  %s242_s7 = inlined_call_operand.vmem [shape: f32[4,1], index: 7, kind: output, shape index: {2}]   ;;  %s243_s1 = inlined_call_operand.vmem [shape: f32[4,1], index: 1, kind: input, shape index: {}]   ;;  %s244_s2 = inlined_call_operand.vmem [shape: f32[4,1], index: 2, kind: input, shape index: {}]   ;;  %s245_s5 = inlined_call_operand.vmem [shape: f32[2,4,256], index: 5, kind: output, shape index: {0}]  }
   0x1   :  { %v187_v0 = vld [vmem:[%s238_s0] sm:$0xff]  ;;  %v192_v1 = vld [vmem:[%s238_s0 + $0x8] sm:$0xff]  ;;  %136 = vset.pattern.permute.xlu0 %v142_v20  ;;  %137 = vset.pattern.permute.xlu1 %v142_v20  ;;  %v92_v48 = vunpack.c.l.s4 %v143_v47  ;;  %v94_v49 = vlaneseq }
   0x2   :  { %v25_v2 = vcombine.high %v187_v0, %v187_v0  ;;  %v28_v3 = vsel %vm27_vm0, %v187_v0, 0.0  ;;  %v33_v4 = vmul.f32 %v187_v0, %v187_v0  ;;  %v45_v5 = vcombine.high %v192_v1, %v192_v1  ;;  %v76_v23 = vld [vmem:[%s239_s3] sm:$0xf] }
   0x3   :  { %v47_v6 = vsel %vm27_vm0, %v192_v1, 0.0  ;;  %v53_v7 = vmul.f32 %v192_v1, %v192_v1  ;;  %v77_v27 = vmul.f32 0.9, %v76_v23  ;;  %v82_v33 = vld [vmem:[%s240_s4] sm:$0xf]  ;;  %v93_v50 = vunpack.c.0.s8 %v92_v48 }
   0x4   :  { %v29_v8 = vsel %vm27_vm0, %v25_v2, 0.0  ;;  %v35_v9 = vcombine.high %v33_v4, %v33_v4  ;;  %v37_v10 = vsel %vm27_vm0, %v33_v4, 0.0  ;;  %v48_v11 = vsel %vm27_vm0, %v45_v5, 0.0  ;;  %v68_v41 = vld [vmem:[%s243_s1] sm:$0xf] }
   0x5   :  { %v30_v12 = vadd.f32 %v29_v8, %v28_v3  ;;  %v55_v13 = vcombine.high %v53_v7, %v53_v7  ;;  %v57_v15 = vsel %vm27_vm0, %v53_v7, 0.0  ;;  %v49_v17 = vadd.f32 %v48_v11, %v47_v6  ;;  %v69_v44 = vld [vmem:[%s244_s2] sm:$0xf] }
   0x6   :  { %v38_v14 = vsel %vm27_vm0, %v35_v9, 0.0  ;;  %v83_v36 = vmul.f32 0.9, %v82_v33  ;;  %v95_v51 = vshrl.u32 %v94_v49, 7 }
   0x7   :  { %31 = vadd.xlane.f32.xlu0 %v30_v12  ;;  %v39_v16 = vadd.f32 %v38_v14, %v37_v10  ;;  %v58_v18 = vsel %vm27_vm0, %v55_v13, 0.0 }
   0x8   :  { %v59_v19 = vadd.f32 %v58_v18, %v57_v15  ;;  %v96_v52 = vsub.s32 %v93_v50, %v95_v51 }
   0x9   :  { %40 = vadd.xlane.f32.xlu1 %v39_v16 }
   0xb   :  { %50 = vadd.xlane.f32.xlu0 %v49_v17 }
   0xd   :  { %60 = vadd.xlane.f32.xlu1 %v59_v19 }
  0x94   :  { %v32_v21 = vpop.xlane.xlu0 %31 }
  0x96   :  { %v41_v22 = vpop.xlane.xlu1 %40 }
  0x98   :  { %v51_v24 = vpop.xlane.xlu0 %50 }
  0x99   :  { %v52_v25 = vadd.f32 %v51_v24, %v32_v21 }
  0x9a   :  { %v61_v26 = vpop.xlane.xlu1 %60 }
  0x9b   :  { %v63_v28 = vmul.f32 0.001953125, %v52_v25  ;;  %v62_v29 = vadd.f32 %v61_v26, %v41_v22 }
  0x9d   :  { %v75_v30 = vmul.f32 0.1, %v63_v28  ;;  %v64_v31 = vmul.f32 0.001953125, %v62_v29  ;;  %v65_v32 = vmul.f32 %v63_v28, %v63_v28 }
  0x9f   :  { %v78_v34 = vadd.f32 %v77_v27, %v75_v30  ;;  %v66_v35 = vsub.f32 %v64_v31, %v65_v32 }
  0xa1   :  { %80 = vst.msk [vmem:[%s241_s6] sm:$0xf] %vm79_vm1, %v78_v34  ;;  %v67_v37 = vmax.f32 %v66_v35, 0.0 }
  0xa3   :  { %v70_v38 = vadd.f32 1e-05, %v67_v37  ;;  %v81_v39 = vmul.f32 0.1, %v67_v37 }
  0xa5   :  { %140 = vrsqrt.f32 %v70_v38  ;;  %v84_v40 = vadd.f32 %v83_v36, %v81_v39 }
  0xa7   :  { %85 = vst.msk [vmem:[%s242_s7] sm:$0xf] %vm79_vm1, %v84_v40 }
  0xaf   :  { %v141_v42 = vpop.eup %140 }
  0xb0   :  { %v72_v43 = vmul.f32 %v141_v42, %v68_v41 }
  0xb2   :  { %89 = vperm.xlu0 %136, %v72_v43   ;;  %v73_v45 = vmul.f32 %v72_v43, %v63_v28 }
  0xb4   :  { %v74_v46 = vsub.f32 %v69_v44, %v73_v45 }
  0xb6   :  { %102 = vperm.xlu1 %137, %v74_v46  }
 0x131   :  { %v90_v53 = vpop.permute.xlu0 %89 }
 0x132   :  { %v97_v54 = vrot.slane %v90_v53, %v96_v52 }
 0x134   :  { %v99_v56 = vmul.f32 %v97_v54, %v187_v0  ;;  %v115_v57 = vmul.f32 %v192_v1, %v97_v54 }
 0x135   :  { %v103_v55 = vpop.permute.xlu1 %102 }
 0x136   :  { %v110_v58 = vrot.slane %v103_v55, %v96_v52 }
 0x138   :  { %v112_v59 = vadd.f32 %v110_v58, %v99_v56  ;;  %v116_v60 = vadd.f32 %v115_v57, %v110_v58 }
 0x13a   :  { %113 = vst [vmem:[%s245_s5] sm:$0xff] %v112_v59  ;;  %133 = vst [vmem:[%s245_s5 + $0x8] sm:$0xff] %v116_v60 }

</bundles_post_ra>
